<compile_context>
chip_gen: v7x
topology: tpu7x:2x2x1
jax: 0.10.0
libtpu: 0.0.40
codegen_flags: <defaults>
</compile_context>

<pallas_src>
import functools

import jax
import jax.numpy as jnp
from jax.experimental import pallas as pl
from jax.experimental.pallas import tpu as pltpu


def _layernorm_kernel(x_ref, gamma_ref, beta_ref, o_ref, *, eps):
    x = x_ref[...]                                    # (tile_rows, F), input dtype
    xf = x.astype(jnp.float32)
    n = xf.shape[-1]

    # Pass 1: mean.
    mean = jnp.sum(xf, axis=-1, keepdims=True) * (1.0 / n)      # (tile_rows, 1)

    # Pass 2: unbiased variance on centered data (numerically safe; both
    # reductions stay in VMEM so this costs no extra HBM traffic).
    centered = xf - mean
    # F == 1 -> 0/0 = NaN, matching torch.std(unbiased) on a single element.
    inv_nm1 = (1.0 / (n - 1)) if n > 1 else float("nan")
    var_unbiased = jnp.sum(centered * centered, axis=-1, keepdims=True) * inv_nm1
    std = jnp.sqrt(var_unbiased)

    # Per-row reciprocal of (std + eps); bulk work below is pure VPU mul/add.
    inv = 1.0 / (std + eps)                           # (tile_rows, 1)

    gamma = gamma_ref[...].astype(jnp.float32)        # (1, F)
    beta = beta_ref[...].astype(jnp.float32)          # (1, F)

    out = (centered * inv) * gamma + beta
    o_ref[...] = out.astype(o_ref.dtype)


def _row_align(dtype):
    """Sublane packing alignment for the row (second-minor) dim."""
    itemsize = jnp.dtype(dtype).itemsize
    if itemsize >= 4:
        return 8
    if itemsize == 2:
        return 16
    return 32            # 8-bit dtypes pack 32 rows per sublane group


def _vmem_budgets():
    """(tile_budget_bytes, vmem_limit_bytes) chosen per TPU generation."""
    try:
        vmem_bytes = int(pltpu.get_tpu_info().vmem_capacity_bytes)
    except Exception:
        vmem_bytes = 128 * 1024 * 1024
    if vmem_bytes <= 64 * 1024 * 1024:
        # v7x-class: 64 MiB physical; leave headroom for Mosaic scratch.
        return 20 * 1024 * 1024, 40 * 1024 * 1024
    # v5e / v6e: 128 MiB physical; exploit it for big double-buffered tiles.
    return 48 * 1024 * 1024, 96 * 1024 * 1024


def _pick_tile_rows(rows, feat, dtype, tile_budget):
    """Row tile: ~4 MiB of input per grid step (amortizes ~0.35 us/step),
    bounded by the VMEM budget (2x in + 2x out buffers + ~3 f32 temps/elem),
    capped at ceil(rows/2) so v7x's two TensorCores both get work."""
    itemsize = jnp.dtype(dtype).itemsize
    align = _row_align(dtype)

    # Double-buffered input + output (input dtype) + ~3 f32 temporaries
    # (xf, centered, pre-cast out) per element.
    bytes_per_row = feat * (4 * itemsize + 3 * 4)
    cap_rows = max(align, tile_budget // max(bytes_per_row, 1))
    # TODO(synk): for huge F (>= ~64K f32 on 64 MiB parts) even an `align`-row
    # tile can exceed VMEM; would need an F-chunked in-kernel reduction.

    target_in_bytes = 4 * 1024 * 1024
    target_rows = max(align, target_in_bytes // max(feat * itemsize, 1))

    tile = min(target_rows, cap_rows)

    # Ensure >= 2 grid tiles when rows allow (megacore / v7x 2-TC sharding).
    two_way = ((rows + 1) // 2 + align - 1) // align * align
    tile = min(tile, two_way)

    # Never exceed the (aligned) row count.
    rows_aligned = (rows + align - 1) // align * align
    tile = min(tile, rows_aligned)

    # Align down to the packing granule.
    tile = max(align, (tile // align) * align)
    return tile


def layer_norm(x, gamma, beta, eps=1e-8, tile_rows=None):
    """x: (..., F).  gamma, beta: (F,).  Returns same shape/dtype as x."""
    orig_shape = x.shape
    feat = orig_shape[-1]
    x2 = x.reshape(-1, feat)
    rows = x2.shape[0]

    tile_budget, vmem_limit = _vmem_budgets()
    if tile_rows is None:
        tile_rows = _pick_tile_rows(rows, feat, x.dtype, tile_budget)

    # Ragged last block handled by Pallas (no pad/slice HBM round-trip).
    num_tiles = pl.cdiv(rows, tile_rows)

    gamma2 = gamma.reshape(1, feat)
    beta2 = beta.reshape(1, feat)

    kernel = functools.partial(_layernorm_kernel, eps=float(eps))

    out = pl.pallas_call(
        kernel,
        out_shape=jax.ShapeDtypeStruct((rows, feat), x.dtype),
        grid_spec=pltpu.PrefetchScalarGridSpec(
            num_scalar_prefetch=0,
            grid=(num_tiles,),
            in_specs=[
                pl.BlockSpec((tile_rows, feat), lambda i: (i, 0)),
                pl.BlockSpec((1, feat), lambda i: (0, 0)),
                pl.BlockSpec((1, feat), lambda i: (0, 0)),
            ],
            out_specs=pl.BlockSpec((tile_rows, feat), lambda i: (i, 0)),
        ),
        compiler_params=pltpu.CompilerParams(
            dimension_semantics=("parallel",),
            vmem_limit_bytes=int(vmem_limit),
        ),
    )(x2, gamma2, beta2)

    return out.reshape(orig_shape)


def _reference(x, gamma, beta, eps):
    mean = jnp.mean(x, axis=-1, keepdims=True)
    n = x.shape[-1]
    var = jnp.sum((x - mean) ** 2, axis=-1, keepdims=True) / (n - 1)
    std = jnp.sqrt(var)
    return gamma * (x - mean) / (std + eps) + beta


if __name__ == "__main__":
    key = jax.random.PRNGKey(0)
    eps = 1e-8

    # Small demo shape; feature dim lane-dense (multiple of 128).
    B, S, H = 2, 8, 128
    x = jax.random.normal(key, (B, S, H), dtype=jnp.float32)
    gamma = jnp.ones((H,), dtype=jnp.float32)   # nn.Parameter(torch.ones(features))
    beta = jnp.zeros((H,), dtype=jnp.float32)   # nn.Parameter(torch.zeros(features))

    out = layer_norm(x, gamma, beta, eps)
    out = jax.block_until_ready(out)
    ref = _reference(x, gamma, beta, eps)
    assert jnp.allclose(out, ref, atol=1e-5, rtol=1e-5), "mismatch vs reference"

    # Ragged-row check: rows % tile_rows != 0 exercises the partial last block
    # (no padding path anymore).
    key2 = jax.random.PRNGKey(1)
    xr = jax.random.normal(key2, (21, H), dtype=jnp.float32) * 3.0 + 5.0
    out_r = layer_norm(xr, gamma, beta, eps, tile_rows=16)
    out_r = jax.block_until_ready(out_r)
    ref_r = _reference(xr, gamma, beta, eps)
    assert jnp.allclose(out_r, ref_r, atol=1e-5, rtol=1e-5), "ragged mismatch"

    print("KERNEL_OK")
</pallas_src>

<mosaic_0001>
module attributes {stable_mosaic.version = 11 : i64} {
  func.func @_layernorm_kernel(%arg0: i32, %arg1: memref<8x128xf32, #tpu.memory_space<vmem>>, %arg2: memref<1x128xf32, #tpu.memory_space<vmem>>, %arg3: memref<1x128xf32, #tpu.memory_space<vmem>>, %arg4: memref<8x128xf32, #tpu.memory_space<vmem>>) attributes {dimension_semantics = [#tpu.dimension_semantics<parallel>], iteration_bounds = array<i64: 2>, scalar_prefetch = 0 : i64, scratch_operands = 0 : i64, tpu.core_type = #tpu.core_type<tc>, window_params = [{transform_indices = @transform_0, window_bounds = array<i64: 8, 128>}, {pipeline_mode = #tpu.pipeline_mode<synchronous>, transform_indices = @transform_1, window_bounds = array<i64: 1, 128>}, {pipeline_mode = #tpu.pipeline_mode<synchronous>, transform_indices = @transform_2, window_bounds = array<i64: 1, 128>}, {transform_indices = @transform_3, window_bounds = array<i64: 8, 128>}]} {
    %c0 = arith.constant 0 : index
    %c0_0 = arith.constant 0 : index
    %0 = vector.load %arg1[%c0, %c0_0] : memref<8x128xf32, #tpu.memory_space<vmem>>, vector<8x128xf32>
    %cst = arith.constant dense<0.000000e+00> : vector<8xf32>
    %1 = vector.multi_reduction <add>, %0, %cst [1] : vector<8x128xf32> to vector<8xf32>
    %2 = vector.shape_cast %1 : vector<8xf32> to vector<8x1xf32>
    %cst_1 = arith.constant 7.812500e-03 : f32
    %3 = vector.broadcast %cst_1 : f32 to vector<8x1xf32>
    %4 = arith.mulf %2, %3 : vector<8x1xf32>
    %5 = vector.broadcast %4 : vector<8x1xf32> to vector<8x128xf32>
    %6 = arith.subf %0, %5 : vector<8x128xf32>
    %7 = arith.mulf %6, %6 : vector<8x128xf32>
    %cst_2 = arith.constant dense<0.000000e+00> : vector<8xf32>
    %8 = vector.multi_reduction <add>, %7, %cst_2 [1] : vector<8x128xf32> to vector<8xf32>
    %9 = vector.shape_cast %8 : vector<8xf32> to vector<8x1xf32>
    %cst_3 = arith.constant 0.00787401571 : f32
    %10 = vector.broadcast %cst_3 : f32 to vector<8x1xf32>
    %11 = arith.mulf %9, %10 : vector<8x1xf32>
    %12 = math.sqrt %11 : vector<8x1xf32>
    %cst_4 = arith.constant 9.99999993E-9 : f32
    %13 = vector.broadcast %cst_4 : f32 to vector<8x1xf32>
    %14 = arith.addf %12, %13 : vector<8x1xf32>
    %cst_5 = arith.constant 1.000000e+00 : f32
    %15 = vector.broadcast %cst_5 : f32 to vector<8x1xf32>
    %16 = arith.divf %15, %14 : vector<8x1xf32>
    %c0_6 = arith.constant 0 : index
    %c0_7 = arith.constant 0 : index
    %17 = vector.load %arg2[%c0_6, %c0_7] : memref<1x128xf32, #tpu.memory_space<vmem>>, vector<1x128xf32>
    %c0_8 = arith.constant 0 : index
    %c0_9 = arith.constant 0 : index
    %18 = vector.load %arg3[%c0_8, %c0_9] : memref<1x128xf32, #tpu.memory_space<vmem>>, vector<1x128xf32>
    %19 = vector.broadcast %16 : vector<8x1xf32> to vector<8x128xf32>
    %20 = arith.mulf %6, %19 : vector<8x128xf32>
    %21 = vector.broadcast %17 : vector<1x128xf32> to vector<8x128xf32>
    %22 = arith.mulf %20, %21 : vector<8x128xf32>
    %23 = vector.broadcast %18 : vector<1x128xf32> to vector<8x128xf32>
    %24 = arith.addf %22, %23 : vector<8x128xf32>
    %c0_10 = arith.constant 0 : index
    %c0_11 = arith.constant 0 : index
    %25 = vector.load %arg4[%c0_10, %c0_11] : memref<8x128xf32, #tpu.memory_space<vmem>>, vector<8x128xf32>
    tpu.vector_store %arg4[%c0_10, %c0_11], %24 {strides = array<i32>} : memref<8x128xf32, #tpu.memory_space<vmem>>, vector<8x128xf32>,
    return
  }
  func.func @transform_0(%arg0: i32) -> (i32, i32) {
    %c0_i32 = arith.constant 0 : i32
    %c0_i32_0 = arith.constant 0 : i32
    return %arg0, %c0_i32 : i32, i32
  }
  func.func @transform_1(%arg0: i32) -> (i32, i32) {
    %c0_i32 = arith.constant 0 : i32
    %c0_i32_0 = arith.constant 0 : i32
    %c0_i32_1 = arith.constant 0 : i32
    return %c0_i32, %c0_i32_0 : i32, i32
  }
  func.func @transform_2(%arg0: i32) -> (i32, i32) {
    %c0_i32 = arith.constant 0 : i32
    %c0_i32_0 = arith.constant 0 : i32
    %c0_i32_1 = arith.constant 0 : i32
    return %c0_i32, %c0_i32_0 : i32, i32
  }
  func.func @transform_3(%arg0: i32) -> (i32, i32) {
    %c0_i32 = arith.constant 0 : i32
    %c0_i32_0 = arith.constant 0 : i32
    return %arg0, %c0_i32 : i32, i32
  }
}

</mosaic_0001>

<bundles_post_ra>
// kernel: tpu_custom_call.1
= control target key start
LH: loop header
LB: loop body
LE: loop exit
PB: predicated region body
PF: predicated region fallthrough
CT: control target
= control target key end

     0   :  { %8 = vsyncpa [#allocation3], 0  ;;  %s852_s0 = inlined_call_operand.hbm [shape: f32[16,128], index: 0, kind: input, shape index: {}]   ;;  %s853_s1 = inlined_call_operand.hbm [shape: f32[1,128], index: 1, kind: input, shape index: {}]   ;;  %s854_s2 = inlined_call_operand.hbm [shape: f32[1,128], index: 2, kind: input, shape index: {}]   ;;  %s855_s3 = inlined_call_operand.hbm [shape: f32[16,128], index: 3, kind: output, shape index: {}]  }
   0x1   :  { %10 = vsyncpa [#allocation3 + $0x1], 0 }
   0x2   :  { %11 = vsyncpa [#allocation6], 0 }
   0x3   :  { %12 = vsyncpa [#allocation4], 0 }
   0x4   :  { %14 = vsyncpa [#allocation4 + $0x1], 0  ;;  %s622_s12 = smov 0   ;;  %s624_s13 = smov 0  }
   0x5   :  { %s626_s14 = smov 0   ;;  %s628_s15 = smov 0  }
   0x6 LB: > { %s643_s16 = sadd.s32 4294967295, %s596_s15   ;;  %s351_s17 = sadd.s32 4294967294, %s596_s15   ;;  %s596_s15 = sphi %s628_s15, %s875_s15   ;;  %s592_s14 = sphi %s626_s14, %s874_s14   ;;  %s588_s13 = sphi %s624_s13, %s873_s13   ;;  %s584_s12 = sphi %s622_s12, %s872_s12  }
   0x7   : > { %p40_p0 = scmp.ne.s32.totalorder %s588_s13, %s584_s12  ;;  %p856_p1 = scmp.eq.s32.totalorder %s643_s16, 0 }
   0x8   : > { %p112_p3 = scmp.eq.s32.totalorder %s351_s17, 1  ;;  %p352_p5 = scmp.ge.s32.totalorder %s596_s15, 1 }
   0x9   : > { %p652_p4 = por %p856_p1, %p40_p0  ;;  %p119_p7 = scmp.lt.s32.totalorder %s596_s15, 3 }
   0xa   : > { %p657_p6 = por %p112_p3, %p40_p0  ;;  %s598_s21 = smov [#allocation5]  }
   0xb   : > { %s859_s18 = scalar_select %p652_p4, 1, 0 }
   0xc   : > { %s860_s19 = scalar_select %p657_p6, 1, 0 }
   0xd   : > { %p662_p8 = pnand %p352_p5, %p119_p7  ;;  %s132_s22 = sshll.u32 %s598_s21, 4  ;;  %s133_s22 = int_to_ptr.vmem [resolvable:$true] %s132_s22 }
   0xe   : > { %s599_s23 = smov [#allocation7]   ;;  %s678_s26 = sadd.s32 1, %s596_s15  }
   0xf   : > { %s861_s20 = scalar_select %p662_p8, 1, 0 }
  0x10   : > { %p381_p10 = pneg %p662_p8  ;;  %s143_s24 = sshll.u32 %s599_s23, 4  ;;  %s675_s24 = int_to_ptr.vmem [resolvable:$true] %s143_s24 }
  0x11   : > { %s24_s27 = ssub.s32 %s596_s15, %s678_s26  ;;  %s440_s30 = scalar_lea.hbm %s853_s1, 16 }
  0x12   : > { %p671_p11 = pnand %p381_p10, %p856_p1  ;;  %p441_p12 = scmp.ne.s32.totalorder %s853_s1, %s440_s30 }
  0x13   : > { %p447_p5 = scmp.lt.u32.totalorder %s440_s30, %s853_s1 }
  0x14   : > { %p442_p13 = pneg %p671_p11 }
  0x16   : > { %p443_p0 = pnand %p442_p13, %p441_p12 }
  0x18   : > { %p444_p3 = pneg %p443_p0 }
  0x1a   : > { %p449_p7 = pnand %p447_p5, %p444_p3 }
  0x1c   : > { %452 = shalt.err (!%p449_p7)
}
  0x1d   : > { %s453_s8 = scalar_lea.vmem %s133_s22, 16  ;;  %s460_s9 = scalar_lea.vmem %s133_s22, 32 }
  0x1e   : > { %p454_p10 = scmp.ne.s32.totalorder %s133_s22, %s453_s8  ;;  %p461_p2 = scmp.lt.s32.totalorder %s133_s22, %s133_s22 }
  0x1f   : > { %p462_p6 = scmp.lt.s32.totalorder %s460_s9, %s453_s8 }
  0x20   : > { %p456_p9 = pnand %p454_p10, %p442_p13 }
  0x21   : > { %p463_p4 = por %p462_p6, %p461_p2 }
  0x22   : > { %p457_p1 = pneg %p456_p9 }
  0x24   : > { %p464_p8 = pnand %p463_p4, %p457_p1 }
  0x26   : > { %467 = shalt.err (!%p464_p8)
}
  0x27   : > { %384 = dma.hbm_to_vmem [thread:$0]  (!%p671_p11), %s853_s1, 16, %s133_s22, [#allocation6]  }
  0x28   : > { %s468_s23 = scalar_lea.hbm %s854_s2, 16 }
  0x29   : > { %p469_p9 = scmp.ne.s32.totalorder %s854_s2, %s468_s23  ;;  %p475_p4 = scmp.lt.u32.totalorder %s468_s23, %s854_s2 }
  0x2b   : > { %p471_p2 = pnand %p469_p9, %p442_p13 }
  0x2d   : > { %p472_p1 = pneg %p471_p2 }
  0x2f   : > { %p477_p6 = pnand %p475_p4, %p472_p1 }
  0x31   : > { %480 = shalt.err (!%p477_p6)
}
  0x32   : > { %s481_s22 = scalar_lea.vmem %s675_s24, 16  ;;  %s488_s5 = scalar_lea.vmem %s675_s24, 32 }
  0x33   : > { %p482_p8 = scmp.ne.s32.totalorder %s675_s24, %s481_s22  ;;  %p489_p3 = scmp.lt.s32.totalorder %s675_s24, %s675_s24 }
  0x34   : > { %p490_p5 = scmp.lt.s32.totalorder %s488_s5, %s481_s22 }
  0x35   : > { %p484_p12 = pnand %p482_p8, %p442_p13 }
  0x36   : > { %p491_p7 = por %p490_p5, %p489_p3 }
  0x37   : > { %p485_p0 = pneg %p484_p12 }
  0x39   : > { %p492_p10 = pnand %p491_p7, %p485_p0 }
  0x3b   : > { %495 = shalt.err (!%p492_p10)
}
  0x3c   : > { %387 = dma.hbm_to_vmem [thread:$0]  (!%p671_p11), %s854_s2, 16, %s675_s24, [#allocation6]  }
  0x3d   : > { %p25_p13 = scmp.eq.s32.totalorder %s24_s27, 0  ;;  %s27_s8 = sadd.s32 1, %s592_s14 }
  0x3e   : > { %p34_p9 = scmp.ne.s32.totalorder %s592_s14, %s588_s13  ;;  %p35_p2 = scmp.eq.s32.totalorder %s596_s15, 0 }
  0x3f   : > { %s738_s25 = scalar_select %p25_p13, %s592_s14, %s27_s8  }
  0x40   : > { %p36_p1 = por %p35_p2, %p34_p9  ;;  %p863_p4 = scmp.eq.s32.totalorder %s643_s16, 1 }
  0x41   : > { %p398_p8 = scmp.lt.s32.totalorder %s596_s15, 2  ;;  %s154_s10 = sand.u32 1, %s592_s14  }
  0x42   : > { %p742_p6 = por %p863_p4, %p34_p9  ;;  %s356_s11 = sshll.u32 %s154_s10, 3 }
  0x43   : > { %s357_s17 = sshll.u32 %s596_s15, 7  ;;  %s158_s27 = scalar_lea.vmem [#allocation2], %s356_s11 }
  0x44   : > { %s752_s24 = scalar_lea.hbm %s852_s0, %s357_s17  ;;  %s165_s28 = sshll.u32 %s158_s27, 4  ;;  %s754_s28 = int_to_ptr.vmem [resolvable:$true] %s165_s28 }
  0x45   : > { %p756_p11 = pnand %p398_p8, %p36_p1  ;;  %s155_s30 = scalar_lea.sflag [#allocation3], %s154_s10 }
  0x46   : > { %s496_s4 = scalar_lea.hbm %s752_s24, 128  ;;  %s501_s6 = scalar_lea.hbm %s852_s0, 256 }
  0x47   : > { %p497_p12 = scmp.ne.s32.totalorder %s752_s24, %s496_s4  ;;  %p498_p0 = pneg %p756_p11 }
  0x48   : > { %p502_p7 = scmp.lt.u32.totalorder %s752_s24, %s852_s0  ;;  %p503_p10 = scmp.lt.u32.totalorder %s501_s6, %s496_s4 }
  0x49   : > { %p499_p3 = pnand %p498_p0, %p497_p12  ;;  %p505_p9 = scmp.lt.u32.totalorder %s496_s4, %s752_s24 }
  0x4a   : > { %p504_p13 = por %p503_p10, %p502_p7 }
  0x4b   : > { %p500_p5 = pneg %p499_p3 }
  0x4c   : > { %p506_p2 = por %p505_p9, %p504_p13 }
  0x4e   : > { %p507_p1 = pnand %p506_p2, %p500_p5 }
  0x50   : > { %510 = shalt.err (!%p507_p1)
}
  0x51   : > { %s511_s10 = scalar_lea.vmem %s754_s28, 128  ;;  %s600_s11 = smov [#allocation2]  }
  0x52   : > { %p512_p4 = scmp.ne.s32.totalorder %s754_s28, %s511_s10  ;;  %s516_s17 = sshll.u32 %s600_s11, 4  ;;  %s517_s17 = int_to_ptr.vmem [resolvable:$false] %s516_s17 }
  0x53   : > { %s518_s21 = scalar_lea.vmem %s517_s17, 256  ;;  %p519_p3 = scmp.lt.s32.totalorder %s754_s28, %s517_s17 }
  0x54   : > { %p514_p8 = pnand %p512_p4, %p498_p0  ;;  %p520_p7 = scmp.lt.s32.totalorder %s518_s21, %s511_s10 }
  0x56   : > { %p515_p12 = pneg %p514_p8  ;;  %p521_p10 = por %p520_p7, %p519_p3 }
  0x58   : > { %p522_p13 = pnand %p521_p10, %p515_p12 }
  0x5a   : > { %525 = shalt.err (!%p522_p13)
}
  0x5b   : > { %391 = dma.hbm_to_vmem [thread:$0]  (!%p756_p11), %s752_s24, 128, %s754_s28, %s155_s30  }
  0x5c   : > { %p866_p5 = scmp.ne.s32.totalorder %s861_s20, 0 }
  0x5d   : > { %s788_s23 = sand.u32 (!%p866_p5), 1, %s588_s13   ;;  %p867_p0 = scmp.ne.s32.totalorder (!%p866_p5), %s859_s18, 0 }
  0x5e   : > { %174 = sbr.rel (%p866_p5) target bundleno = 446 (0x1be), region = 32  ;;  %s359_s27 = sshll.u32 (!%p866_p5), %s788_s23, 3 }
  0x5f   : > { %s177_s4 = scalar_lea.sflag (!%p866_p5), [#allocation3], %s788_s23  ;;  %s180_s22 = scalar_lea.vmem (!%p866_p5), [#allocation2], %s359_s27 }
  0x65   : > { %571 = dma.done.wait (%p867_p0), %s177_s4, 128  }
  0x66   : > { %573 = vsyncadd (%p867_p0), %s177_s4, 4294967168  ;;  %p868_p11 = scmp.eq.s32.totalorder %s643_s16, 0 }
  0x68   : > { %575 = dma.done.wait (%p868_p11), [#allocation6], 32   ;;  %p869_p9 = pmov %p868_p11 }
  0x69   : > { %v211_v0 = vld [vmem:[%s180_s22] sm:$0xff]  ;;  %v363_v14 = vld [vmem:[#allocation5] ss:$0 sm:$0xff]  ;;  %v364_v16 = vld [vmem:[#allocation7] ss:$0 sm:$0xff]  ;;  %s366_s18 = sshll.u32 %s643_s16, 7 }
  0x6a   : > { %577 = vsyncadd (%p869_p9), [#allocation6], 4294967264  ;;  %212 = vadd.xlane.f32.xlu0 %v211_v0  ;;  %s210_s20 = scalar_lea.vmem [#allocation8], %s359_s27  ;;  %s808_s30 = scalar_lea.hbm %s855_s3, %s366_s18 }
  0x6b   : > { %s262_s24 = sshll.u32 %s210_s20, 4  ;;  %s249_s5 = scalar_lea.sflag [#allocation4], %s788_s23  ;;  %s810_s24 = int_to_ptr.vmem [resolvable:$true] %s262_s24 }
  0x6c   : > { %s526_s6 = scalar_lea.vmem %s810_s24, 128  ;;  %s601_s16 = smov [#allocation8]  }
  0x6d   : > { %p527_p2 = scmp.ne.s32.totalorder %s810_s24, %s526_s6  ;;  %s530_s7 = sshll.u32 %s601_s16, 4  ;;  %s531_s7 = int_to_ptr.vmem [resolvable:$false] %s530_s7 }
  0x6e   : > { %s532_s8 = scalar_lea.vmem %s531_s7, 256  ;;  %p533_p8 = scmp.lt.s32.totalorder %s810_s24, %s531_s7 }
  0x6f   : > { %p528_p1 = pnand %p527_p2, %p742_p6  ;;  %p534_p12 = scmp.lt.s32.totalorder %s532_s8, %s526_s6 }
  0x71   : > { %p529_p4 = pneg %p528_p1  ;;  %p535_p3 = por %p534_p12, %p533_p8 }
  0x73   : > { %p536_p7 = pnand %p535_p3, %p529_p4 }
  0xf7   : > { %v213_v1 = vpop.xlane.xlu0 %212 }
  0xf8   : > { %v214_v2 = vmul.f32 0.0078125, %v213_v1 }
  0xfa   : > { %v215_v3 = vsub.f32 %v211_v0, %v214_v2 }
  0xfc   : > { %v216_v4 = vmul.f32 %v215_v3, %v215_v3 }
  0xfe   : > { %217 = vadd.xlane.f32.xlu0 %v216_v4 }
 0x18b   : > { %v218_v5 = vpop.xlane.xlu0 %217 }
 0x18c   : > { %v219_v6 = vmul.f32 0.007874016, %v218_v5 }
 0x18e   : > { %436 = vrsqrt.f32 %v219_v6  ;;  %vm222_vm0 = vcmp.eq.f32.partialorder %v219_v6, inf  ;;  %v225_v9 = vand.u32 2147483648, %v219_v6  ;;  %vm224_vm1 = vcmp.eq.f32.partialorder %v219_v6, 0.0 }
 0x198   : > { %v437_v7 = vpop.eup %436 }
 0x199   : > { %v221_v8 = vmul.f32 %v437_v7, %v219_v6 }
 0x19b   : > { %v223_v10 = vsel %vm222_vm0, %v219_v6, %v221_v8 }
 0x19c   : > { %v226_v11 = vsel %vm224_vm1, %v225_v9, %v223_v10 }
 0x19d   : > { %v227_v12 = vadd.f32 1e-08, %v226_v11 }
 0x19f   : > { %438 = vrcp.f32 %v227_v12 }
 0x1a9   : > { %v439_v13 = vpop.eup %438 }
 0x1aa   : > { %v232_v15 = vmul.f32 %v439_v13, %v215_v3 }
 0x1ac   : > { %v239_v17 = vmul.f32 %v363_v14, %v232_v15 }
 0x1ae   : > { %v246_v18 = vadd.f32 %v364_v16, %v239_v17 }
 0x1b0   : > { %247 = vst [vmem:[%s210_s20] sm:$0xff] %v246_v18 }
 0x1b1   : > { %539 = shalt.err (!%p536_p7)
}
 0x1b2   : > { %s540_s10 = scalar_lea.hbm %s808_s30, 128  ;;  %s544_s21 = scalar_lea.hbm %s855_s3, 256 }
 0x1b3   : > { %p541_p10 = scmp.ne.s32.totalorder %s808_s30, %s540_s10  ;;  %p545_p0 = scmp.lt.u32.totalorder %s808_s30, %s855_s3 }
 0x1b4   : > { %p546_p11 = scmp.lt.u32.totalorder %s544_s21, %s540_s10  ;;  %p548_p2 = scmp.lt.u32.totalorder %s540_s10, %s808_s30 }
 0x1b5   : > { %p542_p13 = pnand %p541_p10, %p742_p6 }
 0x1b6   : > { %p547_p9 = por %p546_p11, %p545_p0 }
 0x1b7   : > { %p543_p5 = pneg %p542_p13 }
 0x1b8   : > { %p549_p1 = por %p548_p2, %p547_p9 }
 0x1ba   : > { %p550_p4 = pnand %p549_p1, %p543_p5 }
 0x1bc   : > { %553 = shalt.err (!%p550_p4)
}
 0x1bd   : > { %379 = dma.vmem_to_hbm [thread:$0]  (%p742_p6), %s810_s24, 128, %s808_s30, %s249_s5  }
 0x1be PF: > { %s274_s4 = sand.u32 1, %s584_s12   ;;  %p870_p8 = scmp.ne.s32.totalorder %s860_s19, 0 }
 0x1bf   : > { %p871_p12 = scmp.ge.s32.totalorder %s596_s15, 2  ;;  %s275_s22 = scalar_lea.sflag [#allocation4], %s274_s4 }
 0x1c1   : > { %p393_p3 = pnand %p871_p12, %p870_p8 }
 0x1c3   : > { %579 = dma.done.wait (!%p393_p3), %s275_s22, 128  }
 0x1c4   : > { %581 = vsyncadd (!%p393_p3), %s275_s22, 4294967168  ;;  %p17_p7 = scmp.ge.s32.totalorder %s678_s26, 4   ;;  %s872_s12 = smov %s588_s13 }
 0x1c5   : > { %s873_s13 = smov %s592_s14  ;;  %s874_s14 = smov %s738_s25 }
 0x1c6   : > { %s875_s15 = smov %s678_s26  ;;  %19 = sbr.rel (!%p17_p7) target bundleno = 6 (0x6), region = 85 }
 0x1cd   :  { %280 = vsyncpa [#allocation3], 1 }
 0x1ce   :  { %282 = vsyncpa [#allocation3 + $0x1], 1 }
 0x1cf   :  { %283 = vsyncpa [#allocation6], 1 }
 0x1d0   :  { %284 = vsyncpa [#allocation4], 1 }
 0x1d1   :  { %286 = vsyncpa [#allocation4 + $0x1], 1 }

</bundles_post_ra>
